<compile_context>
chip_gen: v7x
topology: tpu7x:2x2x1
jax: 0.10.0
libtpu: 0.0.40
codegen_flags: <defaults>
</compile_context>

<pallas_src>
import jax
import jax.numpy as jnp
from jax.experimental import pallas as pl
from jax.experimental.pallas import tpu as pltpu  # noqa: F401  (TPU backend)


def lstm_cell_kernel(x_ref, h_prev_ref, c_prev_ref, wh_ref, wx_ref,
                     gates_ref, hc_ref):
    H = c_prev_ref.shape[1]

    # One fused (B, 4H) pre-activation slab: prev_h @ Wh + x @ Wx.
    z = (jnp.dot(h_prev_ref[...], wh_ref[...],
                 preferred_element_type=jnp.float32)
         + jnp.dot(x_ref[...], wx_ref[...],
                   preferred_element_type=jnp.float32))

    # Lane order is [f | i | o | c_tilde]; sigmoid on the first 3H lanes,
    # tanh on the last H lanes. Lane-select keeps everything vreg-aligned.
    lane = jax.lax.broadcasted_iota(jnp.int32, z.shape, 1)
    gates = jnp.where(lane < 3 * H, jax.nn.sigmoid(z), jnp.tanh(z))

    f = gates[:, 0:H]
    i = gates[:, H:2 * H]
    o = gates[:, 2 * H:3 * H]
    c_tilde = gates[:, 3 * H:4 * H]

    next_c = f * c_prev_ref[...].astype(jnp.float32) + i * c_tilde
    next_h = o * jnp.tanh(next_c)

    gates_ref[...] = gates.astype(gates_ref.dtype)                 # (B, 4H)
    hc_ref[...] = jnp.concatenate([next_h, next_c],
                                  axis=1).astype(hc_ref.dtype)     # (B, 2H)


def stack_lstm_weights(W_f, W_i, W_c, W_o, hidden_size):
    """One-time weight prep (hoisted out of the per-step call path).

    F.linear(hx, W) == hx @ W.T.  Stack the transposed gate weights along the
    output dim in [f, i, o, c_tilde] order, then split rows so the kernel can
    contract prev_h and x separately (no hx concat needed).
    """
    W_stacked = jnp.concatenate(
        [W_f.T, W_i.T, W_o.T, W_c.T], axis=1)     # (H+I, 4H)
    Wh = W_stacked[:hidden_size]                  # (H, 4H)
    Wx = W_stacked[hidden_size:]                  # (I, 4H)
    return Wh, Wx


def visualize_lstm_cell(x, prev_state, Wh, Wx, hidden_size):
    """Pallas VisualizeLSTMCell.forward. Returns (next_h, next_c, (f, i, o, c_tilde))."""
    batch = x.shape[0]
    dtype = x.dtype
    if prev_state is None:
        prev_h = jnp.zeros((batch, hidden_size), dtype=dtype)
        prev_c = jnp.zeros((batch, hidden_size), dtype=dtype)
    else:
        prev_h, prev_c = prev_state

    B, I = x.shape
    H = hidden_size

    full = lambda shape: pl.BlockSpec(shape, lambda: (0,) * len(shape))

    gates, hc = pl.pallas_call(
        lstm_cell_kernel,
        out_shape=(jax.ShapeDtypeStruct((B, 4 * H), dtype),
                   jax.ShapeDtypeStruct((B, 2 * H), dtype)),
        in_specs=[
            full((B, I)),        # x
            full((B, H)),        # prev_h
            full((B, H)),        # prev_c
            full((H, 4 * H)),    # Wh (stacked, pre-transposed)
            full((I, 4 * H)),    # Wx (stacked, pre-transposed)
        ],
        out_specs=(full((B, 4 * H)), full((B, 2 * H))),
    )(x, prev_h, prev_c, Wh, Wx)

    f = gates[:, 0:H]
    i = gates[:, H:2 * H]
    o = gates[:, 2 * H:3 * H]
    c_tilde = gates[:, 3 * H:4 * H]
    next_h = hc[:, :H]
    next_c = hc[:, H:]
    return next_h, next_c, (f, i, o, c_tilde)


def reference(x, prev_state, W_f, W_i, W_c, W_o, hidden_size):
    batch = x.shape[0]
    if prev_state is None:
        prev_h = jnp.zeros((batch, hidden_size), dtype=x.dtype)
        prev_c = jnp.zeros((batch, hidden_size), dtype=x.dtype)
    else:
        prev_h, prev_c = prev_state
    hx = jnp.concatenate([prev_h, x], axis=1)
    f = jax.nn.sigmoid(hx @ W_f.T)
    i = jax.nn.sigmoid(hx @ W_i.T)
    o = jax.nn.sigmoid(hx @ W_o.T)
    c_tilde = jnp.tanh(hx @ W_c.T)
    next_c = f * prev_c + i * c_tilde
    next_h = o * jnp.tanh(next_c)
    return next_h, next_c, (f, i, o, c_tilde)


if __name__ == "__main__":
    import numpy as np

    batch = 8
    input_size = 16
    hidden_size = 32

    key = jax.random.PRNGKey(0)
    kx, kh, kc, kf, ki, kcw, ko = jax.random.split(key, 7)

    # Deterministic parameter init matching reset_parameters: U(-sqrt_k, sqrt_k)
    sqrt_k = (1.0 / hidden_size) ** 0.5
    wshape = (hidden_size, hidden_size + input_size)
    W_f = jax.random.uniform(kf, wshape, jnp.float32, -sqrt_k, sqrt_k)
    W_i = jax.random.uniform(ki, wshape, jnp.float32, -sqrt_k, sqrt_k)
    W_c = jax.random.uniform(kcw, wshape, jnp.float32, -sqrt_k, sqrt_k)
    W_o = jax.random.uniform(ko, wshape, jnp.float32, -sqrt_k, sqrt_k)

    x = jax.random.normal(kx, (batch, input_size), jnp.float32)
    prev_h = jax.random.normal(kh, (batch, hidden_size), jnp.float32)
    prev_c = jax.random.normal(kc, (batch, hidden_size), jnp.float32)

    # One-time weight preparation (done outside the per-step call path).
    Wh, Wx = stack_lstm_weights(W_f, W_i, W_c, W_o, hidden_size)
    Wh, Wx = jax.block_until_ready((Wh, Wx))

    next_h, next_c, (f, i, o, c_tilde) = visualize_lstm_cell(
        x, (prev_h, prev_c), Wh, Wx, hidden_size)
    jax.block_until_ready((next_h, next_c, f, i, o, c_tilde))

    # Also exercise the prev_state=None path once.
    out_none = visualize_lstm_cell(x, None, Wh, Wx, hidden_size)
    jax.block_until_ready(out_none)

    # Correctness check against pure-JAX reference (original weight layout).
    rh, rc, (rf, ri, ro, rct) = reference(
        x, (prev_h, prev_c), W_f, W_i, W_c, W_o, hidden_size)
    for got, want in ((next_h, rh), (next_c, rc), (f, rf), (i, ri),
                      (o, ro), (c_tilde, rct)):
        np.testing.assert_allclose(np.asarray(got), np.asarray(want),
                                   rtol=1e-5, atol=1e-5)

    # prev_state=None path check.
    rh0, rc0, (rf0, ri0, ro0, rct0) = reference(
        x, None, W_f, W_i, W_c, W_o, hidden_size)
    nh0, nc0, (f0, i0, o0, ct0) = out_none
    for got, want in ((nh0, rh0), (nc0, rc0), (f0, rf0), (i0, ri0),
                      (o0, ro0), (ct0, rct0)):
        np.testing.assert_allclose(np.asarray(got), np.asarray(want),
                                   rtol=1e-5, atol=1e-5)

    print("KERNEL_OK")
</pallas_src>

<mosaic_0001>
module attributes {stable_mosaic.version = 11 : i64} {
  func.func @lstm_cell_kernel(%arg0: memref<8x16xf32, #tpu.memory_space<vmem>>, %arg1: memref<8x32xf32, #tpu.memory_space<vmem>>, %arg2: memref<8x32xf32, #tpu.memory_space<vmem>>, %arg3: memref<32x128xf32, #tpu.memory_space<vmem>>, %arg4: memref<16x128xf32, #tpu.memory_space<vmem>>, %arg5: memref<8x128xf32, #tpu.memory_space<vmem>>, %arg6: memref<8x64xf32, #tpu.memory_space<vmem>>) attributes {dimension_semantics = [], scalar_prefetch = 0 : i64, scratch_operands = 0 : i64, tpu.core_type = #tpu.core_type<tc>} {
    %c0 = arith.constant 0 : index
    %c0_0 = arith.constant 0 : index
    %0 = vector.load %arg1[%c0, %c0_0] : memref<8x32xf32, #tpu.memory_space<vmem>>, vector<8x32xf32>
    %c0_1 = arith.constant 0 : index
    %c0_2 = arith.constant 0 : index
    %1 = vector.load %arg3[%c0_1, %c0_2] : memref<32x128xf32, #tpu.memory_space<vmem>>, vector<32x128xf32>
    %cst = arith.constant dense<0.000000e+00> : vector<8x128xf32>
    %2 = tpu.matmul %0, %1, %cst {dimension_numbers = #tpu.dot_dimension_numbers<[1], [0], [0], [1], [0, 0, 1, 1], [], []>} : vector<8x32xf32>, vector<32x128xf32>, vector<8x128xf32> -> vector<8x128xf32>
    %c0_3 = arith.constant 0 : index
    %c0_4 = arith.constant 0 : index
    %3 = vector.load %arg0[%c0_3, %c0_4] : memref<8x16xf32, #tpu.memory_space<vmem>>, vector<8x16xf32>
    %c0_5 = arith.constant 0 : index
    %c0_6 = arith.constant 0 : index
    %4 = vector.load %arg4[%c0_5, %c0_6] : memref<16x128xf32, #tpu.memory_space<vmem>>, vector<16x128xf32>
    %cst_7 = arith.constant dense<0.000000e+00> : vector<8x128xf32>
    %5 = tpu.matmul %3, %4, %cst_7 {dimension_numbers = #tpu.dot_dimension_numbers<[1], [0], [0], [1], [0, 0, 1, 1], [], []>} : vector<8x16xf32>, vector<16x128xf32>, vector<8x128xf32> -> vector<8x128xf32>
    %6 = arith.addf %2, %5 : vector<8x128xf32>
    %7 = tpu.iota {dimensions = array<i32: 1>} : vector<8x128xi32>
    %c96_i32 = arith.constant 96 : i32
    %8 = vector.broadcast %c96_i32 : i32 to vector<8x128xi32>
    %9 = arith.cmpi slt, %7, %8 : vector<8x128xi32>
    %10 = arith.negf %6 : vector<8x128xf32>
    %11 = math.exp %10 : vector<8x128xf32>
    %cst_8 = arith.constant 1.000000e+00 : f32
    %12 = vector.broadcast %cst_8 : f32 to vector<8x128xf32>
    %13 = arith.addf %12, %11 : vector<8x128xf32>
    %14 = arith.divf %12, %13 : vector<8x128xf32>
    %15 = math.tanh %6 : vector<8x128xf32>
    %16 = arith.select %9, %14, %15 : vector<8x128xi1>, vector<8x128xf32>
    %17 = vector.extract_strided_slice %16 {offsets = [0, 0], sizes = [8, 32], strides = [1, 1]} : vector<8x128xf32> to vector<8x32xf32>
    %18 = vector.extract_strided_slice %16 {offsets = [0, 32], sizes = [8, 32], strides = [1, 1]} : vector<8x128xf32> to vector<8x32xf32>
    %19 = vector.extract_strided_slice %16 {offsets = [0, 64], sizes = [8, 32], strides = [1, 1]} : vector<8x128xf32> to vector<8x32xf32>
    %20 = vector.extract_strided_slice %16 {offsets = [0, 96], sizes = [8, 32], strides = [1, 1]} : vector<8x128xf32> to vector<8x32xf32>
    %c0_9 = arith.constant 0 : index
    %c0_10 = arith.constant 0 : index
    %21 = vector.load %arg2[%c0_9, %c0_10] : memref<8x32xf32, #tpu.memory_space<vmem>>, vector<8x32xf32>
    %22 = arith.mulf %17, %21 : vector<8x32xf32>
    %23 = arith.mulf %18, %20 : vector<8x32xf32>
    %24 = arith.addf %22, %23 : vector<8x32xf32>
    %25 = math.tanh %24 : vector<8x32xf32>
    %26 = arith.mulf %19, %25 : vector<8x32xf32>
    %c0_11 = arith.constant 0 : index
    %c0_12 = arith.constant 0 : index
    %27 = vector.load %arg5[%c0_11, %c0_12] : memref<8x128xf32, #tpu.memory_space<vmem>>, vector<8x128xf32>
    tpu.vector_store %arg5[%c0_11, %c0_12], %16 {strides = array<i32>} : memref<8x128xf32, #tpu.memory_space<vmem>>, vector<8x128xf32>,
    %28 = tpu.concatenate %26, %24 in 1 : vector<8x32xf32>, vector<8x32xf32> -> vector<8x64xf32>
    %c0_13 = arith.constant 0 : index
    %c0_14 = arith.constant 0 : index
    %29 = vector.load %arg6[%c0_13, %c0_14] : memref<8x64xf32, #tpu.memory_space<vmem>>, vector<8x64xf32>
    tpu.vector_store %arg6[%c0_13, %c0_14], %28 {strides = array<i32>} : memref<8x64xf32, #tpu.memory_space<vmem>>, vector<8x64xf32>,
    return
  }
}

</mosaic_0001>

<bundles_post_ra>
// kernel: tpu_custom_call.1
= control target key start
LH: loop header
LB: loop body
LE: loop exit
PB: predicated region body
PF: predicated region fallthrough
CT: control target
= control target key end

     0   :  { %12 = vsyncpa [#allocation3], 0  ;;  %s692_s0 = inlined_call_operand.hbm [shape: f32[8,16], index: 0, kind: input, shape index: {}]   ;;  %s693_s1 = inlined_call_operand.hbm [shape: f32[8,32], index: 1, kind: input, shape index: {}]   ;;  %s694_s2 = inlined_call_operand.hbm [shape: f32[8,32], index: 2, kind: input, shape index: {}]   ;;  %s695_s3 = inlined_call_operand.hbm [shape: f32[32,128], index: 3, kind: input, shape index: {}]   ;;  %s696_s4 = inlined_call_operand.hbm [shape: f32[16,128], index: 4, kind: input, shape index: {}]   ;;  %s697_s5 = inlined_call_operand.hbm [shape: f32[8,128], index: 5, kind: output, shape index: {0}]   ;;  %s698_s6 = inlined_call_operand.hbm [shape: f32[8,64], index: 6, kind: output, shape index: {1}]  }
   0x1   :  { %13 = vsyncpa [#allocation6], 0 }
   0x2   :  { %14 = vsyncpa [#allocation9], 0 }
   0x3   :  { %15 = vsyncpa [#allocation4], 0 }
   0x4   :  { %16 = vsyncpa [#allocation13], 0  ;;  %s540_s21 = smov [#allocation5]   ;;  %s541_s23 = smov [#allocation8]  }
   0x5   :  { %s33_s22 = sshll.u32 %s540_s21, 4  ;;  %s52_s24 = sshll.u32 %s541_s23, 4  ;;  %s34_s22 = int_to_ptr.vmem [resolvable:$true] %s33_s22  ;;  %s590_s24 = int_to_ptr.vmem [resolvable:$true] %s52_s24 }
   0x6   :  { %s376_s27 = scalar_lea.hbm %s693_s1, 128 }
   0x7   :  { %p377_p0 = scmp.ne.s32.totalorder %s693_s1, %s376_s27  ;;  %p380_p1 = scmp.lt.u32.totalorder %s376_s27, %s693_s1 }
   0x9   :  { %p382_p2 = pnand %p380_p1, %p377_p0 }
   0xb   :  { %385 = shalt.err (!%p382_p2)
}
   0xc   :  { %s386_s8 = scalar_lea.vmem %s34_s22, 128  ;;  %p391_p4 = scmp.lt.s32.totalorder %s34_s22, %s34_s22 }
   0xd   :  { %p387_p3 = scmp.ne.s32.totalorder %s34_s22, %s386_s8  ;;  %p392_p5 = scmp.lt.s32.totalorder %s386_s8, %s386_s8 }
   0xf   :  { %p393_p6 = por %p392_p5, %p391_p4 }
  0x11   :  { %p394_p7 = pnand %p393_p6, %p387_p3 }
  0x13   :  { %397 = shalt.err (!%p394_p7)
}
  0x14   :  { %36 = dma.hbm_to_vmem [thread:$0]  %s693_s1, 128, %s34_s22, [#allocation6]  }
  0x15   :  { %s398_s13 = scalar_lea.hbm %s695_s3, 512 }
  0x16   :  { %p399_p8 = scmp.ne.s32.totalorder %s695_s3, %s398_s13  ;;  %p402_p9 = scmp.lt.u32.totalorder %s398_s13, %s695_s3 }
  0x18   :  { %p404_p10 = pnand %p402_p9, %p399_p8 }
  0x1a   :  { %407 = shalt.err (!%p404_p10)
}
  0x1b   :  { %s408_s18 = scalar_lea.vmem %s590_s24, 512  ;;  %p413_p12 = scmp.lt.s32.totalorder %s590_s24, %s590_s24 }
  0x1c   :  { %p409_p11 = scmp.ne.s32.totalorder %s590_s24, %s408_s18  ;;  %p414_p13 = scmp.lt.s32.totalorder %s408_s18, %s408_s18 }
  0x1e   :  { %p415_p0 = por %p414_p13, %p413_p12 }
  0x20   :  { %p416_p1 = pnand %p415_p0, %p409_p11 }
  0x22   :  { %419 = shalt.err (!%p416_p1)
}
  0x23   :  { %s542_s1 = smov 128   ;;  %s543_s19 = smov 8  }
  0x24   :  { %58 = dma.hbm_to_vmem [thread:$0]  %s695_s3, 512, %s590_s24, [#allocation9], %s542_s1, %s542_s1, %s543_s19  }
  0x25   :  { %s544_s22 = smov [#allocation2]   ;;  %s545_s25 = smov [#allocation7]  }
  0x26   :  { %s23_s23 = sshll.u32 %s544_s22, 4  ;;  %s43_s26 = sshll.u32 %s545_s25, 4  ;;  %s24_s23 = int_to_ptr.vmem [resolvable:$true] %s23_s23  ;;  %s44_s26 = int_to_ptr.vmem [resolvable:$true] %s43_s26 }
  0x27   :  { %s420_s29 = scalar_lea.hbm %s692_s0, 128 }
  0x28   :  { %p421_p2 = scmp.ne.s32.totalorder %s692_s0, %s420_s29  ;;  %p424_p3 = scmp.lt.u32.totalorder %s420_s29, %s692_s0 }
  0x2a   :  { %p426_p4 = pnand %p424_p3, %p421_p2 }
  0x2c   :  { %429 = shalt.err (!%p426_p4)
}
  0x2d   :  { %s430_s3 = scalar_lea.vmem %s24_s23, 128  ;;  %p435_p6 = scmp.lt.s32.totalorder %s24_s23, %s24_s23 }
  0x2e   :  { %p431_p5 = scmp.ne.s32.totalorder %s24_s23, %s430_s3  ;;  %p436_p7 = scmp.lt.s32.totalorder %s430_s3, %s430_s3 }
  0x30   :  { %p437_p8 = por %p436_p7, %p435_p6 }
  0x32   :  { %p438_p9 = pnand %p437_p8, %p431_p5 }
  0x34   :  { %441 = shalt.err (!%p438_p9)
}
  0x35   :  { %26 = dma.hbm_to_vmem [thread:$0]  %s692_s0, 128, %s24_s23, [#allocation3]  }
  0x36   :  { %s442_s13 = scalar_lea.hbm %s694_s2, 128 }
  0x37   :  { %p443_p10 = scmp.ne.s32.totalorder %s694_s2, %s442_s13  ;;  %p446_p11 = scmp.lt.u32.totalorder %s442_s13, %s694_s2 }
  0x39   :  { %p448_p12 = pnand %p446_p11, %p443_p10 }
  0x3b   :  { %451 = shalt.err (!%p448_p12)
}
  0x3c   :  { %s452_s18 = scalar_lea.vmem %s44_s26, 128  ;;  %p457_p0 = scmp.lt.s32.totalorder %s44_s26, %s44_s26 }
  0x3d   :  { %p453_p13 = scmp.ne.s32.totalorder %s44_s26, %s452_s18  ;;  %p458_p1 = scmp.lt.s32.totalorder %s452_s18, %s452_s18 }
  0x3f   :  { %p459_p2 = por %p458_p1, %p457_p0 }
  0x41   :  { %p460_p3 = pnand %p459_p2, %p453_p13 }
  0x43   :  { %463 = shalt.err (!%p460_p3)
}
  0x44   :  { %46 = dma.hbm_to_vmem [thread:$0]  %s694_s2, 128, %s44_s26, [#allocation6]  }
  0x45   :  { %s546_s21 = smov [#allocation10]   ;;  %s464_s27 = scalar_lea.hbm %s696_s4, 256 }
  0x46   :  { %s64_s22 = sshll.u32 %s546_s21, 4  ;;  %p465_p4 = scmp.ne.s32.totalorder %s696_s4, %s464_s27  ;;  %s65_s22 = int_to_ptr.vmem [resolvable:$true] %s64_s22 }
  0x47   :  { %p468_p5 = scmp.lt.u32.totalorder %s464_s27, %s696_s4 }
  0x49   :  { %p470_p6 = pnand %p468_p5, %p465_p4 }
  0x4b   :  { %473 = shalt.err (!%p470_p6)
}
  0x4c   :  { %s474_s8 = scalar_lea.vmem %s65_s22, 256  ;;  %p479_p8 = scmp.lt.s32.totalorder %s65_s22, %s65_s22 }
  0x4d   :  { %p475_p7 = scmp.ne.s32.totalorder %s65_s22, %s474_s8  ;;  %p480_p9 = scmp.lt.s32.totalorder %s474_s8, %s474_s8 }
  0x4f   :  { %p481_p10 = por %p480_p9, %p479_p8 }
  0x51   :  { %p482_p11 = pnand %p481_p10, %p475_p7 }
  0x53   :  { %485 = shalt.err (!%p482_p11)
}
  0x54   :  { %70 = dma.hbm_to_vmem [thread:$0]  %s696_s4, 256, %s65_s22, [#allocation9], %s542_s1, %s542_s1, %s543_s19  }
  0x55   :  { %530 = dma.done.wait [#allocation3], 128  }
  0x56   :  { %531 = vsyncadd [#allocation3], 4294967168 }
  0x57   :  { %532 = dma.done.wait [#allocation6], 256  }
  0x58   :  { %533 = vsyncadd [#allocation6], 4294967040 }
  0x59   :  { %534 = dma.done.wait [#allocation9], 768  }
  0x5a   :  { %535 = vsyncadd [#allocation9], 4294966528  ;;  %v547_v0 = vmov 0.0|0.0   ;;  %vm548_vm0 = vmmov 0   ;;  %v549_v1 = vmov 0.0   ;;  %v87_v2 = vld [vmem:[#allocation8] sm:$0xff]  ;;  %v242_v21 = vlaneseq }
  0x5b   :  { %346 = vmatprep.subr.bf16.mxu0 %v547_v0  ;;  %343 = vmatprep.subr.bf16.mxu1 %v547_v0  ;;  %v88_v3 = vld [vmem:[#allocation8 + $0x8] sm:$0xff]  ;;  %v92_v4 = vld [vmem:[#allocation10] sm:$0xff]  ;;  %v89_v7 = vld [vmem:[#allocation8 + $0x10] sm:$0xff]  ;;  %vm94_vm1 = vcmask 130048   ;;  %vm168_vm2 = vcmask 261120   ;;  %s550_s4 = smov 64  }
  0x5c   :  { %329 = vmatprep.mubr.msk.f32.mxu1 %vm548_vm0, %v549_v1  ;;  %340 = vmatprep.mubr.msk.f32.mxu0 %vm548_vm0, %v549_v1  ;;  %v347_v5 = vpack.c.bf16 %v88_v3, %v87_v2  ;;  %v93_v6 = vld [vmem:[#allocation10 + $0x8] sm:$0xff]  ;;  %v90_v8 = vld [vmem:[#allocation8 + $0x18] sm:$0xff]  ;;  %v86_v12 = vld [vmem:[#allocation5] sm:$0xff]  ;;  %v243_v22 = vand.u32 127, %v242_v21  ;;  %s551_s1 = smov 96   ;;  %s552_s19 = smov 32  }
  0x5d   :  { %v344_v9 = vpack.c.bf16 %v93_v6, %v92_v4  ;;  %v350_v10 = vpack.c.bf16 %v90_v8, %v89_v7  ;;  %v91_v11 = vld [vmem:[#allocation2] sm:$0xff]  ;;  %v253_v28 = vld [vmem:[#allocation7] sm:$0xff]  ;;  %s553_s9 = smov [#allocation11]  }
  0x5e   :  { %348 = vmatpush3.bf16.msra.mxu0 %v347_v5  ;;  %vm244_vm3 = vcmp.lt.s32.totalorder %v243_v22, 96  ;;  %s289_s3 = sshll.u32 %s553_s9, 4  ;;  %s290_s3 = int_to_ptr.vmem [resolvable:$true] %s289_s3 }
  0x5f   :  { %345 = vmatpush3.bf16.msra.mxu1 %v344_v9  ;;  %349 = vmatprep.subr.bf16.mxu0 %v547_v0  ;;  %s486_s24 = scalar_lea.vmem %s290_s3, 128  ;;  %p491_p13 = scmp.lt.s32.totalorder %s290_s3, %s290_s3 }
  0x60   :  { %p487_p12 = scmp.ne.s32.totalorder %s290_s3, %s486_s24  ;;  %p492_p0 = scmp.lt.s32.totalorder %s486_s24, %s486_s24 }
  0x62   :  { %351 = vmatpush3.bf16.msra.mxu0 %v350_v10  ;;  %330 = vmatmul.mubr.msk.f32.vlgmr.msra.gmra.mrb[0].mxu1 %vm94_vm1, %v91_v11  ;;  %p493_p1 = por %p492_p0, %p491_p13 }
  0x64   :  { %p494_p2 = pnand %p493_p1, %p487_p12 }
  0x65   :  { %341 = vmatmul.mubr.msk.f32.vlgmr.msra.gmra.mrb[0].mxu0 %vm168_vm2, %v86_v12 }
 0x135   :  { %v164_v13 = vpop.f32.mrb[0].mxu1 }
 0x136   :  { %v331_v14 = vpop.f32.mrb[1].mxu1 }
 0x138   :  { %v238_v15 = vpop.f32.mrb[0].mxu0 }
 0x139   :  { %v239_v16 = vadd.f32 %v238_v15, %v164_v13  ;;  %v342_v17 = vpop.f32.mrb[1].mxu0 }
 0x13b   :  { %v316_v18 = vmul.f32 -1.442695, %v239_v16 }
 0x13d   :  { %368 = vpow2.f32 %v316_v18 }
 0x13e   :  { %370 = vtanh.f32 %v239_v16 }
 0x147   :  { %v369_v19 = vpop.eup %368 }
 0x148   :  { %v248_v20 = vadd.f32 1.0, %v369_v19  ;;  %v371_v23 = vpop.eup %370 }
 0x14a   :  { %372 = vrcp.f32 %v248_v20 }
 0x154   :  { %v373_v24 = vpop.eup %372 }
 0x155   :  { %v252_v25 = vsel %vm244_vm3, %v373_v24, %v371_v23 }
 0x156   :  { %256 = vrot.lane.b32.xlu0 %v252_v25, %s550_s4  ;;  %271 = vst [vmem:[#allocation11] sm:$0xff] %v252_v25  ;;  %v254_v29 = vmul.f32 %v253_v28, %v252_v25 }
 0x1c8   :  { %v257_v26 = vpop.permute.xlu0 %256 }
 0x1c9   :  { %v259_v27 = vmul.f32 %v257_v26, %v252_v25 }
 0x1cb   :  { %261 = vrot.lane.b32.xlu0 %v259_v27, %s551_s1 }
 0x23d   :  { %v262_v30 = vpop.permute.xlu0 %261 }
 0x23e   :  { %v264_v31 = vadd.f32 %v262_v30, %v254_v29 }
 0x240   :  { %374 = vtanh.f32 %v264_v31  ;;  %277 = vrot.lane.b32.xlu0 %v264_v31, %s552_s19 }
 0x24a   :  { %v375_v32 = vpop.eup %374 }
 0x24b   :  { %267 = vrot.lane.b32.xlu1 %v375_v32, %s550_s4 }
 0x24c   :  { %497 = shalt.err (!%p494_p2)
}
 0x24d   :  { %s498_s12 = scalar_lea.hbm %s697_s5, 128 }
 0x24e   :  { %p499_p3 = scmp.ne.s32.totalorder %s697_s5, %s498_s12  ;;  %p502_p4 = scmp.lt.u32.totalorder %s498_s12, %s697_s5 }
 0x250   :  { %p504_p5 = pnand %p502_p4, %p499_p3 }
 0x252   :  { %507 = shalt.err (!%p504_p5)
}
 0x253   :  { %292 = dma.vmem_to_hbm [thread:$0]  %s290_s3, 128, %s697_s5, [#allocation4]   ;;  %vm281_vm4 = vcmask 523264  }
 0x254   :  { %s554_s0 = smov [#allocation12]  }
 0x255   :  { %s299_s20 = sshll.u32 %s554_s0, 4  ;;  %s300_s20 = int_to_ptr.vmem [resolvable:$true] %s299_s20 }
 0x256   :  { %s508_s21 = scalar_lea.vmem %s300_s20, 128  ;;  %p513_p7 = scmp.lt.s32.totalorder %s300_s20, %s300_s20 }
 0x257   :  { %p509_p6 = scmp.ne.s32.totalorder %s300_s20, %s508_s21  ;;  %p514_p8 = scmp.lt.s32.totalorder %s508_s21, %s508_s21 }
 0x259   :  { %p515_p9 = por %p514_p8, %p513_p7 }
 0x25b   :  { %p516_p10 = pnand %p515_p9, %p509_p6 }
 0x2b2   :  { %v278_v35 = vpop.permute.xlu0 %277 }
 0x2bd   :  { %v268_v33 = vpop.permute.xlu1 %267 }
 0x2be   :  { %v270_v34 = vmul.f32 %v268_v33, %v252_v25 }
 0x2c0   :  { %273 = vrot.lane.b32.xlu1 %v270_v34, %s550_s4 }
 0x332   :  { %v274_v36 = vpop.permute.xlu1 %273 }
 0x333   :  { %v280_v37 = vsel %vm168_vm2, %v274_v36, %v278_v35 }
 0x334   :  { %282 = vst.msk [vmem:[#allocation12] sm:$0xff] %vm281_vm4, %v280_v37 }
 0x335   :  { %519 = shalt.err (!%p516_p10)
}
 0x336   :  { %s520_s23 = scalar_lea.hbm %s698_s6, 128 }
 0x337   :  { %p521_p11 = scmp.ne.s32.totalorder %s698_s6, %s520_s23  ;;  %p524_p12 = scmp.lt.u32.totalorder %s520_s23, %s698_s6 }
 0x339   :  { %p526_p13 = pnand %p524_p12, %p521_p11 }
 0x33b   :  { %529 = shalt.err (!%p526_p13)
}
 0x33c   :  { %302 = dma.vmem_to_hbm [thread:$0]  %s300_s20, 128, %s698_s6, [#allocation13]  }
 0x33d   :  { %536 = dma.done.wait [#allocation4], 128  }
 0x33e   :  { %537 = vsyncadd [#allocation4], 4294967168 }
 0x33f   :  { %538 = dma.done.wait [#allocation13], 128  }
 0x340   :  { %539 = vsyncadd [#allocation13], 4294967168 }
 0x341   :  { %309 = vsyncpa [#allocation3], 1 }
 0x342   :  { %310 = vsyncpa [#allocation6], 1 }
 0x343   :  { %311 = vsyncpa [#allocation9], 1 }
 0x344   :  { %312 = vsyncpa [#allocation4], 1 }
 0x345   :  { %313 = vsyncpa [#allocation13], 1 }

</bundles_post_ra>
